<compile_context>
chip_gen: v7x
topology: tpu7x:2x2x1
jax: 0.10.0
libtpu: 0.0.40
codegen_flags: <defaults>
</compile_context>

<pallas_src>
import functools
import math

import jax
import jax.numpy as jnp
from jax import lax
from jax.experimental import pallas as pl
from jax.experimental.pallas import tpu as pltpu


# ---------------------------------------------------------------------------
# Generation-aware VMEM sizing
# ---------------------------------------------------------------------------

def _vmem_limit_bytes():
    cap = 64 * 1024 * 1024
    try:
        info = pltpu.get_tpu_info()
        cap = int(getattr(info, "vmem_capacity_bytes", cap) or cap)
    except Exception:
        pass
    # ~3/4 of physical VMEM, clamped to a safe range: 96 MiB on 128 MiB parts
    # (v5e/v6e), 48 MiB on 64 MiB parts (v7x), never below the old 32 MiB floor.
    return max(32 * 1024 * 1024, min((cap * 3) // 4, 96 * 1024 * 1024))


VMEM_LIMIT = _vmem_limit_bytes()


# ---------------------------------------------------------------------------
# Tiling helpers
# ---------------------------------------------------------------------------

def _tile(dim, target, align):
    """Block size along `dim`: a divisor of dim, multiple of `align` (or full extent),
    at most `target`; prefers >=2 blocks so megacore has something to split."""
    if dim % align != 0:
        return dim                      # only a full-extent block is legal
    if dim > target:
        t = (min(target, dim) // align) * align
        while t >= align:
            if dim % t == 0:
                return t
            t -= align
        return dim
    half = dim // 2
    if half >= align and half % align == 0:
        return half
    return dim


def _pick_heads(n_heads, dk, tq, skv, d_model, budget_bytes):
    """Heads per attention head-block.  Enforces a lane-dense last dim (hb*dk % 128 == 0
    or hb == n_heads) and a VMEM estimate that includes the f32 accumulator, out and
    residual blocks plus double-buffered inputs."""
    valid = [hb for hb in range(1, n_heads + 1)
             if n_heads % hb == 0 and (hb == n_heads or (hb * dk) % 128 == 0)]

    def vmem_est(hb):
        io = 2 * (2 * (tq + 2 * skv) * hb * dk      # q, k, v tiles (bf16, double-buffered)
                  + 4 * 2 * hb * tq * skv           # prev + raw tiles (f32)
                  + 2 * hb * dk * d_model)          # wo rows (bf16)
        res = 4 * 3 * tq * d_model                  # acc scratch + out + xres (f32)
        return io + res

    fitting = [hb for hb in valid if vmem_est(hb) <= budget_bytes]
    if fitting:
        return max(fitting)
    return min(valid)


# ---------------------------------------------------------------------------
# Fused full-width projection + RoPE kernels (rotation folded into the weights)
# ---------------------------------------------------------------------------

def _q_proj_kernel(x_ref, w_ref, cos_ref, sin_ref, o_ref):
    xb = x_ref[0].astype(jnp.bfloat16)                                   # (ts, D)
    y = jnp.dot(xb, w_ref[...], preferred_element_type=jnp.float32)      # (ts, 2D)
    d = o_ref.shape[-1]
    q = y[:, :d] * cos_ref[...] + y[:, d:] * sin_ref[...]
    o_ref[0] = q.astype(o_ref.dtype)


def q_rope_proj(x, wq_cat, cos_full, sin_full):
    B, S, D = x.shape
    ts = _tile(S, 512, 8)
    # TODO(synk): at very large D the resident (D, 2D) weight needs a contraction/column
    # tiling axis; at typical d_model it fits comfortably once and is fetched only once.
    return pl.pallas_call(
        _q_proj_kernel,
        out_shape=jax.ShapeDtypeStruct((B, S, D), jnp.bfloat16),
        grid=(B, S // ts),
        in_specs=[
            pl.BlockSpec((1, ts, D), lambda b, s: (b, s, 0)),
            pl.BlockSpec((D, 2 * D), lambda b, s: (0, 0)),     # constant index: one fetch
            pl.BlockSpec((ts, D), lambda b, s: (s, 0)),
            pl.BlockSpec((ts, D), lambda b, s: (s, 0)),
        ],
        out_specs=pl.BlockSpec((1, ts, D), lambda b, s: (b, s, 0)),
        compiler_params=pltpu.CompilerParams(
            dimension_semantics=("parallel", "parallel"),
            vmem_limit_bytes=VMEM_LIMIT),
    )(x, wq_cat, cos_full, sin_full)


def _kv_proj_kernel(x_ref, w_ref, cos_ref, sin_ref, k_ref, v_ref):
    xb = x_ref[0].astype(jnp.bfloat16)                                   # (ts, D)
    y = jnp.dot(xb, w_ref[...], preferred_element_type=jnp.float32)      # (ts, 3D)
    d = k_ref.shape[-1]
    k_ref[0] = (y[:, :d] * cos_ref[...] + y[:, d:2 * d] * sin_ref[...]).astype(k_ref.dtype)
    v_ref[0] = y[:, 2 * d:].astype(v_ref.dtype)


def kv_rope_proj(x, wkv_cat, cos_full, sin_full):
    B, S, D = x.shape
    ts = _tile(S, 512, 8)
    return pl.pallas_call(
        _kv_proj_kernel,
        out_shape=(jax.ShapeDtypeStruct((B, S, D), jnp.bfloat16),
                   jax.ShapeDtypeStruct((B, S, D), jnp.bfloat16)),
        grid=(B, S // ts),
        in_specs=[
            pl.BlockSpec((1, ts, D), lambda b, s: (b, s, 0)),
            pl.BlockSpec((D, 3 * D), lambda b, s: (0, 0)),     # constant index: one fetch
            pl.BlockSpec((ts, D), lambda b, s: (s, 0)),
            pl.BlockSpec((ts, D), lambda b, s: (s, 0)),
        ],
        out_specs=(pl.BlockSpec((1, ts, D), lambda b, s: (b, s, 0)),
                   pl.BlockSpec((1, ts, D), lambda b, s: (b, s, 0))),
        compiler_params=pltpu.CompilerParams(
            dimension_semantics=("parallel", "parallel"),
            vmem_limit_bytes=VMEM_LIMIT),
    )(x, wkv_cat, cos_full, sin_full)


# ---------------------------------------------------------------------------
# Attention: scores + RealFormer softmax + PV + out-proj + Admin residual + LayerNorm
# ---------------------------------------------------------------------------

def _attn_kernel(q_ref, k_ref, v_ref, qm_ref, km_ref, prev_ref, wo_ref, xres_ref,
                 gamma_ref, beta_ref, omega_ref, cnt_ref,
                 raw_ref, out_ref, acc_ref, *, scale, causal, dk, tq):
    neg_inf = jnp.float32(-jnp.inf)
    hblk = pl.program_id(2)
    hb = prev_ref.shape[1]

    @pl.when(hblk == 0)
    def _():
        acc_ref[...] = jnp.zeros_like(acc_ref)

    q = q_ref[0]                                  # (tq, hb*dk) bf16, RoPE applied
    k = k_ref[0]                                  # (Skv, hb*dk) bf16
    v = v_ref[0]                                  # (Skv, hb*dk) bf16
    skv = k.shape[0]

    qmask = qm_ref[0] > 0                         # (tq, 1)  padded query rows
    kmask = km_ref[0] > 0                         # (1, Skv) padded key columns
    inv_cnt = 1.0 / (cnt_ref[0] + 1).astype(jnp.float32)

    if causal:
        rows = lax.broadcasted_iota(jnp.int32, (tq, skv), 0) + pl.program_id(1) * tq
        cols = lax.broadcasted_iota(jnp.int32, (tq, skv), 1)
        cmask = cols > rows

    ctx_parts = []
    for h in range(hb):                           # static unroll over the head block
        qh = q[:, h * dk:(h + 1) * dk]
        kh = k[:, h * dk:(h + 1) * dk]
        vh = v[:, h * dk:(h + 1) * dk]
        s = lax.dot_general(qh, kh, (((1,), (1,)), ((), ())),
                            preferred_element_type=jnp.float32) * scale
        s = jnp.where(qmask, neg_inf, s)
        s = jnp.where(kmask, neg_inf, s)
        if causal:
            s = jnp.where(cmask, neg_inf, s)
        raw_ref[0, h] = s                         # raw-score stack stays f32

        # RealFormer: mean over all raw score maps seen so far (running sum carried in).
        avg = (prev_ref[0, h] + s) * inv_cnt
        m = jnp.max(avg, axis=-1, keepdims=True)
        m_safe = jnp.where(m == neg_inf, jnp.float32(0.0), m)
        e = jnp.exp(avg - m_safe)
        denom = jnp.sum(e, axis=-1, keepdims=True)
        # softmax with fully-masked rows mapped to 0 (== torch's nan masked_fill)
        w = jnp.where(denom > 0, e * pl.reciprocal(denom, approx=True), jnp.float32(0.0))
        ctx_parts.append(jnp.dot(w.astype(jnp.bfloat16), vh,
                                 preferred_element_type=jnp.float32))

    ctx = ctx_parts[0] if hb == 1 else jnp.concatenate(ctx_parts, axis=-1)   # (tq, hb*dk)
    # Single contraction over the head-block columns of Wo, accumulated in f32 VMEM.
    acc_ref[...] += jnp.dot(ctx.astype(jnp.bfloat16), wo_ref[...],
                            preferred_element_type=jnp.float32)

    @pl.when(hblk == pl.num_programs(2) - 1)
    def _():
        # Admin residual (f_x * omega + x) followed by LayerNorm(eps=1e-5).
        y = acc_ref[...] * omega_ref[0, 0] + xres_ref[0]
        mu = jnp.mean(y, axis=-1, keepdims=True)
        c = y - mu
        var = jnp.mean(c * c, axis=-1, keepdims=True)
        out_ref[0] = c * lax.rsqrt(var + 1e-5) * gamma_ref[...] + beta_ref[...]


def attention_core(q, k, v, qm, km, prev_sum, wo, xres, gamma, beta, omega, cnt,
                   *, causal, n_heads, scale):
    B, Sq, D = q.shape
    Skv = k.shape[1]
    dk = D // n_heads
    tq = _tile(Sq, 256, 8)
    hb = _pick_heads(n_heads, dk, tq, Skv, D, budget_bytes=VMEM_LIMIT // 2)
    hdk = hb * dk

    kernel = functools.partial(_attn_kernel, scale=scale, causal=causal, dk=dk, tq=tq)
    flops = int(4 * B * n_heads * Sq * Skv * dk + 2 * B * Sq * D * D)
    bytes_accessed = int(2 * (B * Sq * D + 2 * B * Skv * D)      # q,k,v bf16
                         + 4 * 2 * B * n_heads * Sq * Skv        # prev + raw f32
                         + 4 * 2 * B * Sq * D                    # xres + out f32
                         + 2 * D * D)                            # wo bf16

    return pl.pallas_call(
        kernel,
        out_shape=(jax.ShapeDtypeStruct((B, n_heads, Sq, Skv), jnp.float32),
                   jax.ShapeDtypeStruct((B, Sq, D), jnp.float32)),
        grid=(B, Sq // tq, n_heads // hb),
        in_specs=[
            pl.BlockSpec((1, tq, hdk), lambda b, qi, h: (b, qi, h)),
            pl.BlockSpec((1, Skv, hdk), lambda b, qi, h: (b, 0, h)),
            pl.BlockSpec((1, Skv, hdk), lambda b, qi, h: (b, 0, h)),
            pl.BlockSpec((1, tq, 1), lambda b, qi, h: (b, qi, 0)),
            pl.BlockSpec((1, 1, Skv), lambda b, qi, h: (b, 0, 0)),
            pl.BlockSpec((1, hb, tq, Skv), lambda b, qi, h: (b, h, qi, 0)),
            pl.BlockSpec((hdk, D), lambda b, qi, h: (h, 0)),
            pl.BlockSpec((1, tq, D), lambda b, qi, h: (b, qi, 0)),
            pl.BlockSpec((1, D), lambda b, qi, h: (0, 0)),
            pl.BlockSpec((1, D), lambda b, qi, h: (0, 0)),
            pl.BlockSpec(memory_space=pltpu.MemorySpace.SMEM),   # omega (1,1) f32
            pl.BlockSpec(memory_space=pltpu.MemorySpace.SMEM),   # prev_count (1,) i32
        ],
        out_specs=(pl.BlockSpec((1, hb, tq, Skv), lambda b, qi, h: (b, h, qi, 0)),
                   pl.BlockSpec((1, tq, D), lambda b, qi, h: (b, qi, 0))),
        scratch_shapes=[pltpu.VMEM((tq, D), jnp.float32)],
        compiler_params=pltpu.CompilerParams(
            dimension_semantics=("parallel", "parallel", "arbitrary"),
            vmem_limit_bytes=VMEM_LIMIT),
        cost_estimate=pl.CostEstimate(flops=flops,
                                      transcendentals=int(B * n_heads * Sq * Skv),
                                      bytes_accessed=bytes_accessed),
    )(q, k, v, qm, km, prev_sum, wo, xres, gamma, beta, omega, cnt)


# ---------------------------------------------------------------------------
# SwiGLU FFN + Admin residual + LayerNorm (tiled, d_ff as the reduction axis)
# ---------------------------------------------------------------------------

def _swiglu_ln_kernel(x_ref, w_ref, v_ref, w2_ref, gamma_ref, beta_ref, omega_ref,
                      o_ref, acc_ref):
    fstep = pl.program_id(1)

    @pl.when(fstep == 0)
    def _():
        acc_ref[...] = jnp.zeros_like(acc_ref)

    x = x_ref[...]
    xb = x.astype(jnp.bfloat16)
    h = jnp.dot(xb, w_ref[...], preferred_element_type=jnp.float32)
    g = jnp.dot(xb, v_ref[...], preferred_element_type=jnp.float32)
    act = (jax.nn.silu(h) * g).astype(jnp.bfloat16)          # SiLU sigmoid on the EUP
    acc_ref[...] += jnp.dot(act, w2_ref[...], preferred_element_type=jnp.float32)

    @pl.when(fstep == pl.num_programs(1) - 1)
    def _():
        y = acc_ref[...] * omega_ref[0, 0] + x               # Admin residual epilogue
        mu = jnp.mean(y, axis=-1, keepdims=True)
        c = y - mu
        var = jnp.mean(c * c, axis=-1, keepdims=True)
        o_ref[...] = c * lax.rsqrt(var + 1e-5) * gamma_ref[...] + beta_ref[...]


def swiglu_ln(x, w_t, v_t, w2_t, omega, gamma, beta):
    M, D = x.shape
    F = w_t.shape[1]
    tm = _tile(M, 512, 8)
    tf = _tile(F, 512, 128)
    flops = int(6 * M * D * F)
    bytes_accessed = int(4 * 2 * M * D + 2 * 3 * D * F)
    return pl.pallas_call(
        _swiglu_ln_kernel,
        out_shape=jax.ShapeDtypeStruct((M, D), jnp.float32),
        grid=(M // tm, F // tf),
        in_specs=[
            pl.BlockSpec((tm, D), lambda i, f: (i, 0)),
            pl.BlockSpec((D, tf), lambda i, f: (0, f)),
            pl.BlockSpec((D, tf), lambda i, f: (0, f)),
            pl.BlockSpec((tf, D), lambda i, f: (f, 0)),
            pl.BlockSpec((1, D), lambda i, f: (0, 0)),
            pl.BlockSpec((1, D), lambda i, f: (0, 0)),
            pl.BlockSpec(memory_space=pltpu.MemorySpace.SMEM),   # omega (1,1) f32
        ],
        out_specs=pl.BlockSpec((tm, D), lambda i, f: (i, 0)),
        scratch_shapes=[pltpu.VMEM((tm, D), jnp.float32)],
        compiler_params=pltpu.CompilerParams(
            dimension_semantics=("parallel", "arbitrary"),
            vmem_limit_bytes=VMEM_LIMIT),
        cost_estimate=pl.CostEstimate(flops=flops, transcendentals=int(M * F),
                                      bytes_accessed=bytes_accessed),
    )(x, w_t, v_t, w2_t, gamma, beta, omega)


# ---------------------------------------------------------------------------
# Module-level forward (glue only: mask casts, running-sum carry, cheap reshapes)
# ---------------------------------------------------------------------------

def mha_forward(p, src_q, src_kv, q_pad, kv_pad, prev_stack, prev_sum, *, resid,
                causal, n_heads, cos_full, sin_full, omega, ln_g, ln_b):
    B, Sq, D = src_q.shape
    Skv = src_kv.shape[1]
    dk = D // n_heads

    q = q_rope_proj(src_q, p["wq_cat"], cos_full[:Sq], sin_full[:Sq])
    k, v = kv_rope_proj(src_kv, p["wkv_cat"], cos_full[:Skv], sin_full[:Skv])

    qm = q_pad.astype(jnp.float32)[:, :, None]       # (B, Sq, 1)
    km = kv_pad.astype(jnp.float32)[:, None, :]      # (B, 1, Skv)

    if prev_stack is None:
        cnt = 0
        prev_sum = jnp.zeros((B, n_heads, Sq, Skv), jnp.float32)
    else:
        cnt = prev_stack.shape[0]
        if prev_sum is None:
            # TODO(synk): multi-layer callers should pass the running sum returned below
            # instead of letting us re-reduce the growing raw-score stack here.
            prev_sum = prev_stack.sum(0)
    cnt_arr = jnp.full((1,), cnt, jnp.int32)

    raw, out = attention_core(q, k, v, qm, km, prev_sum, p["wo_bf"], resid,
                              ln_g, ln_b, omega, cnt_arr,
                              causal=causal, n_heads=n_heads, scale=dk ** -0.5)
    new_stack = raw[None] if prev_stack is None else jnp.concatenate([prev_stack, raw[None]], 0)
    new_sum = prev_sum + raw         # O(L) running RealFormer state for the next layer
    # NOTE: nn.Dropout is identity in eval mode.
    return out, new_stack, new_sum


def decoder_layer_forward(params, tgt, memory, tgt_pad, mem_pad, prev_sa, prev_ca, *,
                          n_heads, prev_sa_sum=None, prev_ca_sum=None):
    B, St, D = tgt.shape
    sa_norm, sa_w, _sa_sum = mha_forward(
        params["sa"], tgt, tgt, tgt_pad, tgt_pad, prev_sa, prev_sa_sum,
        resid=tgt, causal=True, n_heads=n_heads,
        cos_full=params["cos_full"], sin_full=params["sin_full"],
        omega=params["omega1"], ln_g=params["ln1_g"], ln_b=params["ln1_b"])
    ca_norm, ca_w, _ca_sum = mha_forward(
        params["ca"], sa_norm, memory, tgt_pad, mem_pad, prev_ca, prev_ca_sum,
        resid=sa_norm, causal=False, n_heads=n_heads,
        cos_full=params["cos_full"], sin_full=params["sin_full"],
        omega=params["omega2"], ln_g=params["ln2_g"], ln_b=params["ln2_b"])
    out = swiglu_ln(ca_norm.reshape(-1, D), params["W_bf"], params["V_bf"],
                    params["W2_bf"], params["omega3"], params["ln3_g"],
                    params["ln3_b"]).reshape(B, St, D)
    return out, sa_w, ca_w


# ---------------------------------------------------------------------------
# Pure-JAX reference (mirrors the PyTorch forward; matmul operands rounded to bf16
# with f32 accumulation to match the kernels' MXU policy)
# ---------------------------------------------------------------------------

def _bf16_mm(a, b):
    return jnp.dot(a.astype(jnp.bfloat16), b.astype(jnp.bfloat16),
                   preferred_element_type=jnp.float32)


def _ref_rope(x, cos, sin):
    x2 = x.reshape(x.shape[:-1] + (-1, 2))
    rot = jnp.stack([-x2[..., 1], x2[..., 0]], axis=-1).reshape(x.shape)
    return x * cos + rot * sin


def _ref_mha(p, src_q, src_kv, q_pad, kv_pad, prev, causal, n_heads, cos_tab, sin_tab):
    B, Sq, D = src_q.shape
    Skv = src_kv.shape[1]
    dk = D // n_heads
    split = lambda x: x.reshape(B, -1, n_heads, dk).transpose(0, 2, 1, 3)
    q = _ref_rope(split(_bf16_mm(src_q, p["wq"])), cos_tab[:Sq], sin_tab[:Sq])
    k = _ref_rope(split(_bf16_mm(src_kv, p["wk"])), cos_tab[:Skv], sin_tab[:Skv])
    v = split(_bf16_mm(src_kv, p["wv"]))
    s = jnp.einsum("bhqd,bhkd->bhqk", q.astype(jnp.bfloat16), k.astype(jnp.bfloat16),
                   preferred_element_type=jnp.float32) * dk ** -0.5
    s = jnp.where(q_pad[:, None, :, None], -jnp.inf, s)
    s = jnp.where(kv_pad[:, None, None, :], -jnp.inf, s)
    if causal:
        tri = jnp.tril(jnp.ones((Sq, Sq), jnp.float32))
        s = jnp.where(tri == 0, -jnp.inf, s)
    prev_new = s[None] if prev is None else jnp.concatenate([prev, s[None]], 0)
    avg = prev_new.mean(0)
    m = avg.max(-1, keepdims=True)
    e = jnp.exp(avg - m)
    w = e / e.sum(-1, keepdims=True)
    w = jnp.where(jnp.isnan(w), 0.0, w)
    attn = jnp.einsum("bhqk,bhkd->bhqd", w.astype(jnp.bfloat16), v.astype(jnp.bfloat16),
                      preferred_element_type=jnp.float32)
    attn = attn.transpose(0, 2, 1, 3).reshape(B, Sq, D)
    return _bf16_mm(attn, p["wo"]), prev_new


def _ref_admin_ln(a, b, omega, g, be):
    y = a * omega[0, 0] + b
    mu = y.mean(-1, keepdims=True)
    var = ((y - mu) ** 2).mean(-1, keepdims=True)
    return (y - mu) / jnp.sqrt(var + 1e-5) * g[0] + be[0]


def _ref_decoder_layer(params, tgt, memory, tgt_pad, mem_pad, prev_sa, prev_ca, n_heads):
    cos_tab, sin_tab = params["cos"], params["sin"]
    sa, sa_w = _ref_mha(params["sa"], tgt, tgt, tgt_pad, tgt_pad, prev_sa, True,
                        n_heads, cos_tab, sin_tab)
    sa_norm = _ref_admin_ln(sa, tgt, params["omega1"], params["ln1_g"], params["ln1_b"])
    ca, ca_w = _ref_mha(params["ca"], sa_norm, memory, tgt_pad, mem_pad, prev_ca, False,
                        n_heads, cos_tab, sin_tab)
    ca_norm = _ref_admin_ln(ca, sa_norm, params["omega2"], params["ln2_g"], params["ln2_b"])
    h = _bf16_mm(ca_norm, params["W_t"])
    gate = _bf16_mm(ca_norm, params["V_t"])
    ff = _bf16_mm(jax.nn.silu(h) * gate, params["W2_t"])
    out = _ref_admin_ln(ff, ca_norm, params["omega3"], params["ln3_g"], params["ln3_b"])
    return out, sa_w, ca_w


# ---------------------------------------------------------------------------
# Deterministic parameter construction (+ kernel-layout / bf16 weight derivation)
# ---------------------------------------------------------------------------

def make_params(key, n_heads, d_model, d_ff, n_layers, max_seq):
    dk = d_model // n_heads
    ks = jax.random.split(key, 5)

    def w(k, shape, fan_in):
        return jax.random.normal(k, shape, jnp.float32) * (fan_in ** -0.5)

    # RoPE buffers exactly as in the PyTorch module: dim = dk // 2, theta repeated
    # pairwise, positions start at 1, table width == dk.
    dim = dk // 2
    theta = jnp.exp(-jnp.arange(dim, dtype=jnp.float32) * math.log(10000.0) / dim)
    theta = jnp.repeat(theta, 2)
    pos = jnp.arange(1, max_seq + 1, dtype=jnp.float32)[:, None]
    ang = pos * theta[None, :]
    cos_tab, sin_tab = jnp.cos(ang), jnp.sin(ang)                    # (max_seq, dk)
    cos_full = jnp.tile(cos_tab, (1, n_heads))                       # (max_seq, D)
    sin_full = jnp.tile(sin_tab, (1, n_heads))

    # Constant +/-1 pairwise-rotation ((x0, x1) -> (-x1, x0)), folded into the
    # projection weights so no rotation work happens inside the kernels.
    idx = jnp.arange(dk)
    ii, jj = idx[:, None], idx[None, :]
    rot = (jnp.where((jj == ii - 1) & (jj % 2 == 0), -1.0, 0.0)
           + jnp.where((jj == ii + 1) & (jj % 2 == 1), 1.0, 0.0)).astype(jnp.float32)

    def fold_rot(wm):                      # (D, D) -> (D, D), per-head column rotation
        w3 = wm.reshape(d_model, n_heads, dk)
        return jnp.einsum('dhj,jk->dhk', w3, rot).reshape(d_model, d_model)

    bf = lambda a: a.astype(jnp.bfloat16)  # kernel-only weights stored bf16

    def attn_p(k):
        k0, k1, k2, k3 = jax.random.split(k, 4)
        wq = w(k0, (d_model, d_model), d_model)
        wk = w(k1, (d_model, d_model), d_model)
        wv = w(k2, (d_model, d_model), d_model)
        wo = w(k3, (d_model, d_model), d_model)
        return {"wq": wq, "wk": wk, "wv": wv, "wo": wo,
                "wq_cat": bf(jnp.concatenate([wq, fold_rot(wq)], axis=1)),
                "wkv_cat": bf(jnp.concatenate([wk, fold_rot(wk), wv], axis=1)),
                "wo_bf": bf(wo)}

    W_t = w(ks[2], (d_model, d_ff), d_model)
    V_t = w(ks[3], (d_model, d_ff), d_model)
    W2_t = w(ks[4], (d_ff, d_model), d_ff)

    # TODO(synk): admin_torch's exact omega init is approximated as sqrt(3*n_layers+1);
    # it is a learnable scalar, so any deterministic value preserves forward semantics.
    omega = jnp.full((1, 1), (3 * n_layers + 1) ** 0.5, jnp.float32)
    ones = jnp.ones((1, d_model), jnp.float32)
    zeros = jnp.zeros((1, d_model), jnp.float32)

    return {
        "sa": attn_p(ks[0]), "ca": attn_p(ks[1]),
        "W_t": W_t, "V_t": V_t, "W2_t": W2_t,
        "W_bf": bf(W_t), "V_bf": bf(V_t), "W2_bf": bf(W2_t),
        "ln1_g": ones, "ln1_b": zeros,
        "ln2_g": ones, "ln2_b": zeros,
        "ln3_g": ones, "ln3_b": zeros,
        "omega1": omega, "omega2": omega, "omega3": omega,
        "cos": cos_tab, "sin": sin_tab,
        "cos_full": cos_full, "sin_full": sin_full,
    }


if __name__ == "__main__":
    n_heads, d_model, d_ff, n_layers = 4, 32, 64, 2
    B, St, Sm = 2, 8, 16

    key = jax.random.PRNGKey(0)
    kp, kt, kmem = jax.random.split(key, 3)
    params = make_params(kp, n_heads, d_model, d_ff, n_layers, max_seq=64)

    tgt = jax.random.normal(kt, (B, St, d_model), jnp.float32)
    memory = jax.random.normal(kmem, (B, Sm, d_model), jnp.float32)
    tgt_len = jnp.array([St, St - 2])
    mem_len = jnp.array([Sm, Sm - 3])
    tgt_pad = jnp.arange(St)[None, :] >= tgt_len[:, None]     # True = padded
    mem_pad = jnp.arange(Sm)[None, :] >= mem_len[:, None]

    out, sa_w, ca_w = decoder_layer_forward(params, tgt, memory, tgt_pad, mem_pad,
                                            None, None, n_heads=n_heads)
    jax.block_until_ready((out, sa_w, ca_w))

    ref_out, ref_sa_w, ref_ca_w = _ref_decoder_layer(params, tgt, memory, tgt_pad,
                                                     mem_pad, None, None, n_heads)

    def check(a, b):
        fa, fb = jnp.isfinite(a), jnp.isfinite(b)
        assert bool(jnp.all(fa == fb)), "mask (-inf) pattern mismatch"
        ok = jnp.allclose(jnp.where(fa, a, 0.0), jnp.where(fb, b, 0.0),
                          atol=2e-2, rtol=2e-2)
        assert bool(ok), "value mismatch vs pure-JAX reference"

    check(out, ref_out)
    check(sa_w, ref_sa_w)
    check(ca_w, ref_ca_w)
    print("KERNEL_OK")
</pallas_src>

<mosaic_0001>
module attributes {stable_mosaic.version = 11 : i64} {
  func.func @_q_proj_kernel(%arg0: i32, %arg1: i32, %arg2: memref<1x8x32xf32, #tpu.memory_space<vmem>>, %arg3: memref<32x64xbf16, #tpu.memory_space<vmem>>, %arg4: memref<8x32xf32, #tpu.memory_space<vmem>>, %arg5: memref<8x32xf32, #tpu.memory_space<vmem>>, %arg6: memref<1x8x32xbf16, #tpu.memory_space<vmem>>) attributes {dimension_semantics = [#tpu.dimension_semantics<parallel>, #tpu.dimension_semantics<parallel>], iteration_bounds = array<i64: 2, 1>, scalar_prefetch = 0 : i64, scratch_operands = 0 : i64, tpu.core_type = #tpu.core_type<tc>, window_params = [{transform_indices = @transform_0, window_bounds = array<i64: 1, 8, 32>}, {pipeline_mode = #tpu.pipeline_mode<synchronous>, transform_indices = @transform_1, window_bounds = array<i64: 32, 64>}, {transform_indices = @transform_2, window_bounds = array<i64: 8, 32>}, {transform_indices = @transform_3, window_bounds = array<i64: 8, 32>}, {transform_indices = @transform_4, window_bounds = array<i64: 1, 8, 32>}]} {
    %c0 = arith.constant 0 : index
    %c0_0 = arith.constant 0 : index
    %c0_1 = arith.constant 0 : index
    %0 = vector.load %arg2[%c0, %c0_0, %c0_1] : memref<1x8x32xf32, #tpu.memory_space<vmem>>, vector<1x8x32xf32>
    %1 = vector.shape_cast %0 : vector<1x8x32xf32> to vector<8x32xf32>
    %2 = arith.truncf %1 : vector<8x32xf32> to vector<8x32xbf16>
    %c0_2 = arith.constant 0 : index
    %c0_3 = arith.constant 0 : index
    %3 = vector.load %arg3[%c0_2, %c0_3] : memref<32x64xbf16, #tpu.memory_space<vmem>>, vector<32x64xbf16>
    %cst = arith.constant dense<0.000000e+00> : vector<8x64xf32>
    %4 = tpu.matmul %2, %3, %cst {dimension_numbers = #tpu.dot_dimension_numbers<[1], [0], [0], [1], [0, 0, 1, 1], [], []>} : vector<8x32xbf16>, vector<32x64xbf16>, vector<8x64xf32> -> vector<8x64xf32>
    %5 = vector.extract_strided_slice %4 {offsets = [0, 0], sizes = [8, 32], strides = [1, 1]} : vector<8x64xf32> to vector<8x32xf32>
    %c0_4 = arith.constant 0 : index
    %c0_5 = arith.constant 0 : index
    %6 = vector.load %arg4[%c0_4, %c0_5] : memref<8x32xf32, #tpu.memory_space<vmem>>, vector<8x32xf32>
    %7 = arith.mulf %5, %6 : vector<8x32xf32>
    %8 = vector.extract_strided_slice %4 {offsets = [0, 32], sizes = [8, 32], strides = [1, 1]} : vector<8x64xf32> to vector<8x32xf32>
    %c0_6 = arith.constant 0 : index
    %c0_7 = arith.constant 0 : index
    %9 = vector.load %arg5[%c0_6, %c0_7] : memref<8x32xf32, #tpu.memory_space<vmem>>, vector<8x32xf32>
    %10 = arith.mulf %8, %9 : vector<8x32xf32>
    %11 = arith.addf %7, %10 : vector<8x32xf32>
    %12 = arith.truncf %11 : vector<8x32xf32> to vector<8x32xbf16>
    %c0_8 = arith.constant 0 : index
    %c0_9 = arith.constant 0 : index
    %c0_10 = arith.constant 0 : index
    %13 = vector.load %arg6[%c0_8, %c0_9, %c0_10] : memref<1x8x32xbf16, #tpu.memory_space<vmem>>, vector<1x8x32xbf16>
    %14 = vector.shape_cast %13 : vector<1x8x32xbf16> to vector<8x32xbf16>
    %15 = vector.shape_cast %12 : vector<8x32xbf16> to vector<1x8x32xbf16>
    tpu.vector_store %arg6[%c0_8, %c0_9, %c0_10], %15 {strides = array<i32>} : memref<1x8x32xbf16, #tpu.memory_space<vmem>>, vector<1x8x32xbf16>,
    return
  }
  func.func @transform_0(%arg0: i32, %arg1: i32) -> (i32, i32, i32) {
    %c0_i32 = arith.constant 0 : i32
    %c0_i32_0 = arith.constant 0 : i32
    return %arg0, %arg1, %c0_i32 : i32, i32, i32
  }
  func.func @transform_1(%arg0: i32, %arg1: i32) -> (i32, i32) {
    %c0_i32 = arith.constant 0 : i32
    %c0_i32_0 = arith.constant 0 : i32
    %c0_i32_1 = arith.constant 0 : i32
    return %c0_i32, %c0_i32_0 : i32, i32
  }
  func.func @transform_2(%arg0: i32, %arg1: i32) -> (i32, i32) {
    %c0_i32 = arith.constant 0 : i32
    %c0_i32_0 = arith.constant 0 : i32
    return %arg1, %c0_i32 : i32, i32
  }
  func.func @transform_3(%arg0: i32, %arg1: i32) -> (i32, i32) {
    %c0_i32 = arith.constant 0 : i32
    %c0_i32_0 = arith.constant 0 : i32
    return %arg1, %c0_i32 : i32, i32
  }
  func.func @transform_4(%arg0: i32, %arg1: i32) -> (i32, i32, i32) {
    %c0_i32 = arith.constant 0 : i32
    %c0_i32_0 = arith.constant 0 : i32
    return %arg0, %arg1, %c0_i32 : i32, i32, i32
  }
}

</mosaic_0001>

<bundles_post_ra>
// kernel: tpu_custom_call.1
= control target key start
LH: loop header
LB: loop body
LE: loop exit
PB: predicated region body
PF: predicated region fallthrough
CT: control target
= control target key end

     0   :  { %9 = vsyncpa [#allocation3], 0  ;;  %s1077_s0 = inlined_call_operand.hbm [shape: f32[2,8,32], index: 0, kind: input, shape index: {}]   ;;  %s1078_s1 = inlined_call_operand.hbm [shape: bf16[32,64], index: 1, kind: input, shape index: {}]   ;;  %s1079_s2 = inlined_call_operand.hbm [shape: f32[8,32], index: 2, kind: input, shape index: {}]   ;;  %s1080_s3 = inlined_call_operand.vmem [shape: f32[8,32], index: 3, kind: input, shape index: {}]   ;;  %s1081_s4 = inlined_call_operand.hbm [shape: bf16[2,8,32], index: 4, kind: output, shape index: {}]  }
   0x1   :  { %11 = vsyncpa [#allocation3 + $0x1], 0 }
   0x2   :  { %12 = vsyncpa [#allocation6], 0 }
   0x3   :  { %13 = vsyncpa [#allocation4], 0 }
   0x4   :  { %15 = vsyncpa [#allocation4 + $0x1], 0  ;;  %s823_s15 = smov 0   ;;  %s825_s16 = smov 0  }
   0x5   :  { %s827_s17 = smov 0   ;;  %s829_s18 = smov 0  }
   0x6   :  { %s831_s19 = smov 0   ;;  %s833_s20 = smov 0  }
   0x7 LB: > { %s491_s21 = sadd.s32 4294967295, %s786_s20   ;;  %s492_s22 = sadd.s32 4294967294, %s786_s20   ;;  %s786_s20 = sphi %s833_s20, %s21_s20   ;;  %s782_s19 = sphi %s831_s19, %s1103_s19   ;;  %s778_s18 = sphi %s829_s18, %s1102_s18   ;;  %s774_s17 = sphi %s827_s17, %s1101_s17   ;;  %s770_s16 = sphi %s825_s16, %s1100_s16   ;;  %s766_s15 = sphi %s823_s15, %s1099_s15  }
   0x8   : > { %p55_p0 = scmp.ne.s32.totalorder %s770_s16, %s766_s15  ;;  %p857_p1 = scmp.eq.s32.totalorder %s491_s21, 0 }
   0x9   : > { %p861_p2 = scmp.eq.s32.totalorder %s491_s21, 1  ;;  %p160_p3 = scmp.eq.s32.totalorder %s492_s22, 1 }
   0xa   : > { %s1086_s23 = scalar_select %p857_p1, 1, 0 }
   0xb   : > { %p867_p4 = por %p857_p1, %p55_p0  ;;  %p493_p5 = scmp.ge.s32.totalorder %s786_s20, 1 }
   0xc   : > { %p872_p6 = por %p160_p3, %p55_p0  ;;  %p167_p7 = scmp.lt.s32.totalorder %s786_s20, 3 }
   0xd   : > { %s1088_s25 = scalar_select %p867_p4, 1, 0 }
   0xe   : > { %s1089_s26 = scalar_select %p872_p6, 1, 0 }
   0xf   : > { %p877_p8 = pnand %p493_p5, %p167_p7  ;;  %s788_s28 = smov [#allocation5]  }
  0x10   : > { %s179_s29 = sshll.u32 %s788_s28, 4  ;;  %s789_s5 = smov [#allocation7]   ;;  %s881_s29 = int_to_ptr.vmem [resolvable:$true] %s179_s29 }
  0x11   : > { %p535_p9 = pneg %p877_p8  ;;  %s195_s6 = sshll.u32 %s789_s5, 4  ;;  %s892_s6 = int_to_ptr.vmem [resolvable:$true] %s195_s6 }
  0x12   : > { %s614_s9 = scalar_lea.hbm %s1078_s1, 256 }
  0x13   : > { %p888_p11 = pnand %p535_p9, %p857_p1  ;;  %p615_p12 = scmp.ne.s32.totalorder %s1078_s1, %s614_s9 }
  0x14   : > { %p621_p5 = scmp.lt.u32.totalorder %s614_s9, %s1078_s1 }
  0x15   : > { %p616_p13 = pneg %p888_p11 }
  0x17   : > { %p617_p0 = pnand %p616_p13, %p615_p12 }
  0x19   : > { %p618_p3 = pneg %p617_p0 }
  0x1b   : > { %p623_p7 = pnand %p621_p5, %p618_p3 }
  0x1d   : > { %626 = shalt.err (!%p623_p7)
}
  0x1e   : > { %s627_s14 = scalar_lea.vmem %s881_s29, 256  ;;  %p635_p1 = scmp.lt.s32.totalorder %s881_s29, %s881_s29 }
  0x1f   : > { %p628_p9 = scmp.ne.s32.totalorder %s881_s29, %s627_s14  ;;  %p636_p12 = scmp.lt.s32.totalorder %s627_s14, %s627_s14 }
  0x21   : > { %p630_p10 = pnand %p628_p9, %p616_p13  ;;  %p637_p0 = por %p636_p12, %p635_p1 }
  0x23   : > { %p631_p6 = pneg %p630_p10 }
  0x25   : > { %p638_p4 = pnand %p637_p0, %p631_p6 }
  0x27   : > { %641 = shalt.err (!%p638_p4)
}
  0x28   : > { %s790_s21 = smov 64   ;;  %s791_s22 = smov 4  }
  0x29   : > { %538 = dma.hbm_to_vmem [thread:$0]  (!%p888_p11), %s1078_s1, 256, %s881_s29, [#allocation6], %s790_s21, %s790_s21, %s791_s22  }
  0x2a   : > { %s642_s9 = scalar_lea.hbm %s1079_s2, 128 }
  0x2b   : > { %p643_p1 = scmp.ne.s32.totalorder %s1079_s2, %s642_s9  ;;  %p649_p10 = scmp.lt.u32.totalorder %s642_s9, %s1079_s2 }
  0x2d   : > { %p645_p4 = pnand %p643_p1, %p616_p13 }
  0x2f   : > { %p646_p6 = pneg %p645_p4 }
  0x31   : > { %p651_p3 = pnand %p649_p10, %p646_p6 }
  0x33   : > { %654 = shalt.err (!%p651_p3)
}
  0x34   : > { %s655_s29 = scalar_lea.vmem %s892_s6, 128  ;;  %p663_p12 = scmp.lt.s32.totalorder %s892_s6, %s892_s6 }
  0x35   : > { %p656_p5 = scmp.ne.s32.totalorder %s892_s6, %s655_s29  ;;  %p664_p0 = scmp.lt.s32.totalorder %s655_s29, %s655_s29 }
  0x37   : > { %p658_p7 = pnand %p656_p5, %p616_p13  ;;  %p665_p1 = por %p664_p0, %p663_p12 }
  0x39   : > { %p659_p9 = pneg %p658_p7 }
  0x3b   : > { %p666_p4 = pnand %p665_p1, %p659_p9 }
  0x3d   : > { %669 = shalt.err (!%p666_p4)
}
  0x3e   : > { %541 = dma.hbm_to_vmem [thread:$0]  (!%p888_p11), %s1079_s2, 128, %s892_s6, [#allocation6]  }
  0x3f   : > { %s33_s22 = sadd.s32 1, %s782_s19  ;;  %s42_s28 = sadd.s32 1, %s774_s17 }
  0x40   : > { %p35_p13 = scmp.ge.s32.totalorder %s33_s22, 2  ;;  %p49_p6 = scmp.ne.s32.totalorder %s774_s17, %s770_s16 }
  0x41   : > { %p50_p10 = scmp.eq.s32.totalorder %s786_s20, 0  ;;  %p552_p3 = scmp.lt.s32.totalorder %s786_s20, 2 }
  0x42   : > { %s1105_s22 = smov (%p35_p13, %s33_s22), 0  ;;  %p956_p7 = por %p861_p2, %p49_p6 }
  0x43   : > { %p51_p5 = por %p50_p10, %p49_p6  ;;  %s37_s5 = ssub.s32 %s782_s19, %s1105_s22 }
  0x44   : > { %s1092_s30 = scalar_select %p956_p7, 1, 0 }
  0x45   : > { %s213_s7 = sand.u32 1, %s774_s17   ;;  %p40_p9 = scmp.eq.s32.totalorder %s37_s5, 0 }
  0x46   : > { %s498_s6 = sshll.u32 %s213_s7, 3  ;;  %s499_s8 = sshll.u32 %s782_s19, 7 }
  0x47   : > { %s965_s9 = scalar_select %p40_p9, %s774_s17, %s42_s28  }
  0x48   : > { %s970_s12 = scalar_lea.hbm %s1077_s0, %s499_s8  ;;  %s217_s24 = scalar_lea.vmem [#allocation2], %s498_s6 }
  0x49   : > { %s225_s13 = sshll.u32 %s217_s24, 4  ;;  %p974_p2 = pnand %p552_p3, %p51_p5  ;;  %s978_s13 = int_to_ptr.vmem [resolvable:$true] %s225_s13 }
  0x4a   : > { %s214_s14 = scalar_lea.sflag [#allocation3], %s213_s7  ;;  %s670_s21 = scalar_lea.hbm %s970_s12, 128 }
  0x4b   : > { %p671_p11 = scmp.ne.s32.totalorder %s970_s12, %s670_s21  ;;  %p672_p12 = pneg %p974_p2 }
  0x4c   : > { %s675_s6 = scalar_lea.hbm %s1077_s0, 256  ;;  %p676_p4 = scmp.lt.u32.totalorder %s970_s12, %s1077_s0 }
  0x4d   : > { %p673_p0 = pnand %p672_p12, %p671_p11  ;;  %p677_p13 = scmp.lt.u32.totalorder %s675_s6, %s670_s21 }
  0x4e   : > { %p679_p10 = scmp.lt.u32.totalorder %s670_s21, %s970_s12 }
  0x4f   : > { %p674_p1 = pneg %p673_p0  ;;  %p678_p6 = por %p677_p13, %p676_p4 }
  0x51   : > { %p680_p3 = por %p679_p10, %p678_p6 }
  0x53   : > { %p681_p5 = pnand %p680_p3, %p674_p1 }
  0x55   : > { %684 = shalt.err (!%p681_p5)
}
  0x56   : > { %s685_s7 = scalar_lea.vmem %s978_s13, 128  ;;  %s792_s11 = smov [#allocation2]  }
  0x57   : > { %p686_p9 = scmp.ne.s32.totalorder %s978_s13, %s685_s7  ;;  %s690_s24 = sshll.u32 %s792_s11, 4  ;;  %s691_s24 = int_to_ptr.vmem [resolvable:$false] %s690_s24 }
  0x58   : > { %s692_s28 = scalar_lea.vmem %s691_s24, 256  ;;  %p693_p7 = scmp.lt.s32.totalorder %s978_s13, %s691_s24 }
  0x59   : > { %p688_p11 = pnand %p686_p9, %p672_p12  ;;  %p694_p4 = scmp.lt.s32.totalorder %s692_s28, %s685_s7 }
  0x5b   : > { %p689_p0 = pneg %p688_p11  ;;  %p695_p13 = por %p694_p4, %p693_p7 }
  0x5d   : > { %p696_p6 = pnand %p695_p13, %p689_p0 }
  0x5f   : > { %699 = shalt.err (!%p696_p6)
}
  0x60   : > { %545 = dma.hbm_to_vmem [thread:$0]  (!%p974_p2), %s970_s12, 128, %s978_s13, %s214_s14  }
  0x61   : > { %234 = sbr.rel (%p877_p8) target bundleno = 464 (0x1d0), region = 36  ;;  %s1008_s21 = sand.u32 (!%p877_p8), 1, %s770_s16  }
  0x62   : > { %s501_s5 = sshll.u32 (!%p877_p8), %s1008_s21, 3  ;;  %s237_s6 = scalar_lea.sflag (!%p877_p8), [#allocation3], %s1008_s21 }
  0x63   : > { %s240_s8 = scalar_lea.vmem (!%p877_p8), [#allocation2], %s501_s5  ;;  %p1094_p7 = scmp.ne.s32.totalorder (!%p877_p8), %s1088_s25, 0 }
  0x68   : > { %753 = dma.done.wait (%p1094_p7), %s237_s6, 128  }
  0x69   : > { %755 = vsyncadd (%p1094_p7), %s237_s6, 4294967168  ;;  %p1095_p12 = scmp.ne.s32.totalorder %s1086_s23, 0 }
  0x6b   : > { %757 = dma.done.wait (%p1095_p12), [#allocation6], 384  }
  0x6c   : > { %759 = vsyncadd (%p1095_p12), [#allocation6], 4294966912  ;;  %v793_v0 = vmov 0.0   ;;  %vm794_vm0 = vmmov 0   ;;  %v612_v1 = vld [vmem:[#allocation5] sm:$0xff]   ;;  %v613_v2 = vld [vmem:[#allocation5 + $0x8] sm:$0xff]  }
  0x6d   : > { %515 = vmatprep.subr.bf16.mxu0 %v793_v0  ;;  %519 = vmatprep.mubr.msk.bf16.mxu0 %vm794_vm0, %v793_v0  ;;  %v282_v3 = vld [vmem:[%s240_s8] sm:$0xff]  ;;  %s795_s25 = smov 32   ;;  %vm300_vm1 = vcmask 261120   ;;  %s796_s23 = smov 96   ;;  %vm358_vm2 = vcmask 257024  }
  0x6e   : > { %516 = vmatpush3.bf16.msra.mxu0 %v612_v1  ;;  %v346_v4 = vld [vmem:[%s1080_s3] sm:$0xff]  ;;  %v283_v5 = vpack.c.bf16 %v282_v3, %v282_v3  ;;  %s504_s13 = sshll.u32 %s1008_s21, 2  ;;  %s509_s29 = sshll.u32 %s778_s18, 6 }
  0x6f   : > { %517 = vmatprep.subr.bf16.mxu0 %v793_v0  ;;  %348 = vrot.lane.b32.xlu0 %v346_v4, %s795_s25  ;;  %v344_v12 = vld [vmem:[#allocation7] sm:$0xff]  ;;  %s276_s14 = scalar_lea.vmem [#allocation8], %s504_s13  ;;  %s1028_s24 = scalar_lea.hbm %s1081_s4, %s509_s29 }
  0x70   : > { %s375_s10 = sshll.u32 %s276_s14, 4  ;;  %s361_s28 = scalar_lea.sflag [#allocation4], %s1008_s21  ;;  %s1030_s10 = int_to_ptr.vmem [resolvable:$true] %s375_s10 }
  0x71   : > { %s700_s5 = scalar_lea.vmem %s1030_s10, 64  ;;  %p1096_p2 = scmp.ne.s32.totalorder %s1092_s30, 0 }
  0x72   : > { %518 = vmatpush3.bf16.msra.mxu0 %v613_v2  ;;  %p701_p8 = scmp.ne.s32.totalorder %s1030_s10, %s700_s5  ;;  %s797_s18 = smov [#allocation8]  }
  0x73   : > { %s704_s6 = sshll.u32 %s797_s18, 4  ;;  %s705_s6 = int_to_ptr.vmem [resolvable:$false] %s704_s6 }
  0x74   : > { %p702_p1 = pnand %p701_p8, %p1096_p2  ;;  %s706_s8 = scalar_lea.vmem %s705_s6, 128 }
  0x75   : > { %520 = vmatmul.mubr.msk.bf16.vlgmr.msra.gmra.mrb[0].mxu0 %vm300_vm1, %v283_v5  ;;  %p707_p3 = scmp.lt.s32.totalorder %s1030_s10, %s705_s6  ;;  %p708_p5 = scmp.lt.s32.totalorder %s706_s8, %s700_s5 }
  0x76   : > { %p703_p10 = pneg %p702_p1 }
  0x77   : > { %p709_p9 = por %p708_p5, %p707_p3 }
  0x79   : > { %p710_p11 = pnand %p709_p9, %p703_p10 }
  0xe1   : > { %v349_v6 = vpop.permute.xlu0 %348 }
 0x148   : > { %v338_v7 = vpop.f32.mrb[0].mxu0 }
 0x149   : > { %v351_v8 = vmul.f32 %v349_v6, %v338_v7  ;;  %v521_v9 = vpop.f32.mrb[1].mxu0  ;;  %v345_v13 = vmul.f32 %v344_v12, %v338_v7 }
 0x14a   : > { %v341_v10 = vpop.f32.mrb[2].mxu0 }
 0x14b   : > { %353 = vrot.lane.b32.xlu0 %v351_v8, %s796_s23  ;;  %v522_v11 = vpop.f32.mrb[3].mxu0 }
 0x1bd   : > { %v354_v14 = vpop.permute.xlu0 %353 }
 0x1be   : > { %v356_v15 = vadd.f32 %v354_v14, %v345_v13 }
 0x1c0   : > { %v357_v16 = vpack.c.bf16 %v356_v15, %v356_v15 }
 0x1c2   : > { %359 = vst.msk [vmem:[%s276_s14] sm:$0xf] %vm358_vm2, %v357_v16 }
 0x1c3   : > { %713 = shalt.err (!%p710_p11)
}
 0x1c4   : > { %s714_s21 = scalar_lea.hbm %s1028_s24, 64  ;;  %s718_s25 = scalar_lea.hbm %s1081_s4, 128 }
 0x1c5   : > { %p715_p0 = scmp.ne.s32.totalorder %s1028_s24, %s714_s21  ;;  %p719_p6 = scmp.lt.u32.totalorder %s1028_s24, %s1081_s4 }
 0x1c6   : > { %p720_p7 = scmp.lt.u32.totalorder %s718_s25, %s714_s21  ;;  %p722_p8 = scmp.lt.u32.totalorder %s714_s21, %s1028_s24 }
 0x1c7   : > { %p716_p4 = pnand %p715_p0, %p1096_p2 }
 0x1c8   : > { %p721_p12 = por %p720_p7, %p719_p6 }
 0x1c9   : > { %p717_p13 = pneg %p716_p4 }
 0x1ca   : > { %p723_p1 = por %p722_p8, %p721_p12 }
 0x1cc   : > { %p724_p10 = pnand %p723_p1, %p717_p13 }
 0x1ce   : > { %727 = shalt.err (!%p724_p10)
}
 0x1cf   : > { %533 = dma.vmem_to_hbm [thread:$0]  (%p1096_p2), %s1030_s10, 64, %s1028_s24, %s361_s28  }
 0x1d0 PF: > { %s387_s29 = sand.u32 1, %s766_s15   ;;  %p1097_p3 = scmp.ne.s32.totalorder %s1089_s26, 0 }
 0x1d1   : > { %p1098_p5 = scmp.ge.s32.totalorder %s786_s20, 2  ;;  %s388_s14 = scalar_lea.sflag [#allocation4], %s387_s29 }
 0x1d3   : > { %p547_p9 = pnand %p1098_p5, %p1097_p3 }
 0x1d5   : > { %761 = dma.done.wait (!%p547_p9), %s388_s14, 64  }
 0x1d6   : > { %763 = vsyncadd (!%p547_p9), %s388_s14, 4294967232  ;;  %s21_s20 = sadd.s32 1, %s786_s20   ;;  %s1099_s15 = smov %s770_s16 }
 0x1d7   : > { %p18_p11 = scmp.ge.s32.totalorder %s21_s20, 4   ;;  %s1100_s16 = smov %s774_s17 }
 0x1d8   : > { %s1101_s17 = smov %s965_s9  ;;  %s1102_s18 = smov %s782_s19 }
 0x1d9   : > { %s1103_s19 = smov %s1105_s22  ;;  %20 = sbr.rel (!%p18_p11) target bundleno = 7 (0x7), region = 93 }
 0x1e0   :  { %393 = vsyncpa [#allocation3], 1 }
 0x1e1   :  { %395 = vsyncpa [#allocation3 + $0x1], 1 }
 0x1e2   :  { %396 = vsyncpa [#allocation6], 1 }
 0x1e3   :  { %397 = vsyncpa [#allocation4], 1 }
 0x1e4   :  { %399 = vsyncpa [#allocation4 + $0x1], 1 }

</bundles_post_ra>
